<compile_context>
chip_gen: v7x
topology: tpu7x:2x2x1
jax: 0.10.0
libtpu: 0.0.40
codegen_flags: <defaults>
</compile_context>

<pallas_src>
import jax
import jax.numpy as jnp
from jax import lax
from jax.experimental import pallas as pl
from jax.experimental.pallas import tpu as pltpu

# ---- synthetic module configuration (deterministic, in-script) --------------
NUM_CLASSES = 3          # FastRCNNPredictor(in_features, num_classes)
NUM_CHANNELS = 2         # < 3 -> forward() replicates channel 0 up to 3 channels
CONV1_OUT = 64           # backbone.body.conv1 out_channels
IN_FEATURES = 1024       # roi_heads.box_predictor.cls_score.in_features
IMAGE_MEAN = jnp.array([0.485, 0.456, 0.406], jnp.float32)
IMAGE_STD = jnp.array([0.229, 0.224, 0.225], jnp.float32)

LANE = 128


def _round_up(x, m):
    return (x + m - 1) // m * m


def _pick_row_tile(m):
    # 512-row tiles are the measured sweet spot (~85% of HBM roofline) for a
    # streaming matmul; at toy sizes use a smaller multiple-of-8 tile so the
    # grid still exercises >1 pipelined step.
    if m >= 1024:
        return 512
    return max(8, (m // 2) // 8 * 8)


# ---- Pallas kernels ----------------------------------------------------------
def _matmul_kernel(a_ref, w_ref, o_ref):
    o_ref[...] = jnp.dot(a_ref[...], w_ref[...], preferred_element_type=jnp.float32)


def _matmul_bias_kernel(a_ref, w_ref, b_ref, o_ref):
    o_ref[...] = (jnp.dot(a_ref[...], w_ref[...], preferred_element_type=jnp.float32)
                  + b_ref[...])


def _tiled_matmul(a, w, bias=None, *, tm):
    """(M, K) @ (K, Np) matmul, tiled over M; small weight stays resident in VMEM.

    Np must be a multiple of 128 (lane-dense output stores); M must divide by tm.
    """
    M, K = a.shape
    Np = w.shape[1]
    assert M % tm == 0 and Np % LANE == 0
    in_specs = [pl.BlockSpec((tm, K), lambda i: (i, 0)),     # streamed A tiles
                pl.BlockSpec((K, Np), lambda i: (0, 0))]     # resident weight
    args = [a, w]
    kernel = _matmul_kernel
    if bias is not None:
        in_specs.append(pl.BlockSpec((1, Np), lambda i: (0, 0)))
        args.append(bias)
        kernel = _matmul_bias_kernel
    cost = pl.CostEstimate(
        flops=2 * M * K * Np,
        transcendentals=0,
        bytes_accessed=(M * K * a.dtype.itemsize
                        + K * Np * w.dtype.itemsize
                        + M * Np * 4))
    return pl.pallas_call(
        kernel,
        out_shape=jax.ShapeDtypeStruct((M, Np), jnp.float32),
        grid=(M // tm,),
        in_specs=in_specs,
        out_specs=pl.BlockSpec((tm, Np), lambda i: (i, 0)),
        compiler_params=pltpu.CompilerParams(
            dimension_semantics=("parallel",),       # shards M-tiles across TCs (v7x)
            vmem_limit_bytes=32 * 1024 * 1024),
        cost_estimate=cost,
    )(*args)


# ---- wrappers ----------------------------------------------------------------
def pallas_conv1_fused_norm(images_nchw, conv_w, mean, std, *, num_channels):
    """backbone.body.conv1 (7x7, stride 2, pad 3, bias=False) with the
    GeneralizedRCNNTransform per-channel normalization folded in.

    ((x - mean)/std) conv w == (x - mean) conv (w/std); subtracting the mean
    *before* zero padding keeps padded taps exactly 0 (torch normalizes, then
    the conv zero-pads), so the fold is exact.  Returns NHWC (B, Ho, Wo, OC) f32.
    """
    B, _, H, W = images_nchw.shape
    # forward(): replicate channel 0 up to 3 channels when num_channels < 3.
    # Kept as an explicit (cheap) concat: folding the replication into the
    # weights is not exact at padded borders because the replicated channel is
    # normalized with a different mean than channel 0.
    if num_channels < 3:
        images_nchw = jnp.concatenate(
            [images_nchw] + [images_nchw[:, 0:1]] * (3 - num_channels), axis=1)
    C = images_nchw.shape[1]
    OC = conv_w.shape[0]
    Ho = (H + 6 - 7) // 2 + 1
    Wo = (W + 6 - 7) // 2 + 1

    xz = (images_nchw - mean.reshape(1, C, 1, 1)).astype(jnp.bfloat16)
    xz = jnp.transpose(xz, (0, 2, 3, 1))                         # NHWC, channels on lanes
    xzp = jnp.pad(xz, ((0, 0), (3, 3), (3, 3), (0, 0)))

    # im2col via 49 static strided slices (no fancy-index gather), bf16.
    # TODO(synk): for production image sizes, walk the 7x7 taps inside the kernel
    # (parity-plane decomposition + per-tap accumulation) so the 49x-expanded
    # patches tensor is never materialized in HBM.
    cols = []
    for kh in range(7):
        for kw in range(7):
            cols.append(xzp[:, kh:kh + 2 * Ho:2, kw:kw + 2 * Wo:2, :])  # (B,Ho,Wo,C)
    patches = jnp.stack(cols, axis=3).reshape(B * Ho * Wo, 49 * C)      # K order (kh,kw,c)

    # weight: fold 1/std, reorder rows to (kh, kw, c), zero-pad OC -> 128 lanes.
    w_fold = (conv_w / std.reshape(1, C, 1, 1)).astype(jnp.bfloat16)    # (OC, C, 7, 7)
    wm = jnp.transpose(w_fold, (2, 3, 1, 0)).reshape(49 * C, OC)
    OCp = _round_up(OC, LANE)
    wm = jnp.pad(wm, ((0, 0), (0, OCp - OC)))

    M, K = patches.shape
    tm = _pick_row_tile(M)
    Mp = _round_up(M, tm)
    if Mp != M:
        patches = jnp.pad(patches, ((0, Mp - M), (0, 0)))

    out = _tiled_matmul(patches, wm, tm=tm)                             # (Mp, OCp) f32
    return out[:M, :OC].reshape(B, Ho, Wo, OC)                          # NHWC, channel-last


def pallas_box_predictor(feats, cls_w, cls_b, bbox_w, bbox_b):
    """FastRCNNPredictor: cls_score + bbox_pred fused into one lane-dense matmul."""
    N, F = feats.shape
    nc = cls_w.shape[1]
    w = jnp.concatenate([cls_w, bbox_w], axis=1)               # (F, 5*nc)
    b = jnp.concatenate([cls_b, bbox_b], axis=0)               # (5*nc,)
    Dp = _round_up(w.shape[1], LANE)
    w = jnp.pad(w, ((0, 0), (0, Dp - w.shape[1])))
    b = jnp.pad(b, (0, Dp - b.shape[0])).reshape(1, Dp)
    tn = 128 if N >= 256 else _round_up(N, 8)
    Nr = _round_up(N, tn)
    if Nr != N:
        feats = jnp.pad(feats, ((0, Nr - N), (0, 0)))
    out = _tiled_matmul(feats, w, bias=b, tm=tn)               # (Nr, Dp) f32
    return out[:N, :nc], out[:N, nc:5 * nc]


def faster_rcnn_l1_forward(images, box_features, params):
    """Mirror of FasterRCNNModelL1.forward hot paths (transform normalize +
    channel replication + backbone conv1, and roi_heads.box_predictor).
    conv1 output is returned NHWC (channel-last) for lane-friendly downstream use."""
    c1 = pallas_conv1_fused_norm(
        images, params["conv1_w"], params["image_mean"], params["image_std"],
        num_channels=NUM_CHANNELS)
    # TODO(synk): ResNet stages 2-5, FPN, RPN (anchor gen + NMS), RoIAlign,
    # TwoMLPHead and the custom my_rpn_compute_loss / my_roi_loss have no clean
    # single-kernel Pallas equivalent; box_features stands in for the
    # roi_heads.box_head output feeding the predictor below.
    cls_logits, bbox_deltas = pallas_box_predictor(
        box_features, params["cls_w"], params["cls_b"],
        params["bbox_w"], params["bbox_b"])
    return c1, cls_logits, bbox_deltas


if __name__ == "__main__":
    key = jax.random.PRNGKey(0)
    k1, k2, k3, k4, k5 = jax.random.split(key, 5)

    B, H, W = 2, 16, 16
    x = jax.random.normal(k1, (B, NUM_CHANNELS, H, W), jnp.float32)

    params = dict(
        image_mean=IMAGE_MEAN,
        image_std=IMAGE_STD,
        conv1_w=0.05 * jax.random.normal(k2, (CONV1_OUT, 3, 7, 7), jnp.float32),
        cls_w=0.01 * jax.random.normal(k3, (IN_FEATURES, NUM_CLASSES), jnp.float32),
        cls_b=jnp.zeros((NUM_CLASSES,), jnp.float32),
        bbox_w=0.01 * jax.random.normal(k4, (IN_FEATURES, NUM_CLASSES * 4), jnp.float32),
        bbox_b=jnp.zeros((NUM_CLASSES * 4,), jnp.float32),
    )
    n_rois = 8
    box_feats = jax.random.normal(k5, (n_rois, IN_FEATURES), jnp.float32)

    c1, cls_logits, bbox_deltas = faster_rcnn_l1_forward(x, box_feats, params)
    jax.block_until_ready((c1, cls_logits, bbox_deltas))

    # ---- plain-JAX reference checks -----------------------------------------
    x3 = jnp.concatenate([x] + [x[:, 0:1]] * (3 - NUM_CHANNELS), axis=1)
    mean = IMAGE_MEAN.reshape(1, 3, 1, 1)
    std = IMAGE_STD.reshape(1, 3, 1, 1)

    assert c1.shape == (B, 8, 8, CONV1_OUT)

    # (1) Tight check: same bf16-quantized folded inputs, f32 accumulation.
    xz_ref = (x3 - mean).astype(jnp.bfloat16)
    wf_ref = (params["conv1_w"] / std).astype(jnp.bfloat16)
    ref_bf = lax.conv_general_dilated(
        xz_ref, wf_ref, (2, 2), ((3, 3), (3, 3)),
        dimension_numbers=("NCHW", "OIHW", "NCHW"),
        preferred_element_type=jnp.float32)
    ref_bf = jnp.transpose(ref_bf, (0, 2, 3, 1))                # NHWC
    assert jnp.allclose(c1, ref_bf, atol=2e-3, rtol=2e-3)

    # (2) Module-semantics sanity: full-f32 normalize + conv1 (bf16 MXU inputs
    #     introduce ~1e-2-level rounding at K=147, well inside this tolerance).
    xn = (x3 - mean) / std
    ref_f32 = lax.conv_general_dilated(
        xn, params["conv1_w"], (2, 2), ((3, 3), (3, 3)),
        dimension_numbers=("NCHW", "OIHW", "NCHW"))
    ref_f32 = jnp.transpose(ref_f32, (0, 2, 3, 1))              # NHWC
    assert jnp.allclose(c1, ref_f32, atol=5e-2, rtol=5e-2)

    # (3) Predictor head (f32 path).
    ref_cls = box_feats @ params["cls_w"] + params["cls_b"]
    ref_box = box_feats @ params["bbox_w"] + params["bbox_b"]
    assert jnp.allclose(cls_logits, ref_cls, atol=2e-3, rtol=2e-3)
    assert jnp.allclose(bbox_deltas, ref_box, atol=2e-3, rtol=2e-3)

    print("KERNEL_OK")
</pallas_src>

<mosaic_0001>
module attributes {stable_mosaic.version = 11 : i64} {
  func.func @_matmul_kernel(%arg0: i32, %arg1: memref<64x147xbf16, #tpu.memory_space<vmem>>, %arg2: memref<147x128xbf16, #tpu.memory_space<vmem>>, %arg3: memref<64x128xf32, #tpu.memory_space<vmem>>) attributes {dimension_semantics = [#tpu.dimension_semantics<parallel>], iteration_bounds = array<i64: 2>, scalar_prefetch = 0 : i64, scratch_operands = 0 : i64, tpu.core_type = #tpu.core_type<tc>, window_params = [{transform_indices = @transform_0, window_bounds = array<i64: 64, 147>}, {pipeline_mode = #tpu.pipeline_mode<synchronous>, transform_indices = @transform_1, window_bounds = array<i64: 147, 128>}, {transform_indices = @transform_2, window_bounds = array<i64: 64, 128>}]} {
    %c0 = arith.constant 0 : index
    %c0_0 = arith.constant 0 : index
    %0 = vector.load %arg1[%c0, %c0_0] : memref<64x147xbf16, #tpu.memory_space<vmem>>, vector<64x147xbf16>
    %c0_1 = arith.constant 0 : index
    %c0_2 = arith.constant 0 : index
    %1 = vector.load %arg2[%c0_1, %c0_2] : memref<147x128xbf16, #tpu.memory_space<vmem>>, vector<147x128xbf16>
    %cst = arith.constant dense<0.000000e+00> : vector<64x128xf32>
    %2 = tpu.matmul %0, %1, %cst {dimension_numbers = #tpu.dot_dimension_numbers<[1], [0], [0], [1], [0, 0, 1, 1], [], []>} : vector<64x147xbf16>, vector<147x128xbf16>, vector<64x128xf32> -> vector<64x128xf32>
    %c0_3 = arith.constant 0 : index
    %c0_4 = arith.constant 0 : index
    %3 = vector.load %arg3[%c0_3, %c0_4] : memref<64x128xf32, #tpu.memory_space<vmem>>, vector<64x128xf32>
    tpu.vector_store %arg3[%c0_3, %c0_4], %2 {strides = array<i32>} : memref<64x128xf32, #tpu.memory_space<vmem>>, vector<64x128xf32>,
    return
  }
  func.func @transform_0(%arg0: i32) -> (i32, i32) {
    %c0_i32 = arith.constant 0 : i32
    %c0_i32_0 = arith.constant 0 : i32
    return %arg0, %c0_i32 : i32, i32
  }
  func.func @transform_1(%arg0: i32) -> (i32, i32) {
    %c0_i32 = arith.constant 0 : i32
    %c0_i32_0 = arith.constant 0 : i32
    %c0_i32_1 = arith.constant 0 : i32
    return %c0_i32, %c0_i32_0 : i32, i32
  }
  func.func @transform_2(%arg0: i32) -> (i32, i32) {
    %c0_i32 = arith.constant 0 : i32
    %c0_i32_0 = arith.constant 0 : i32
    return %arg0, %c0_i32 : i32, i32
  }
}

</mosaic_0001>

<bundles_post_ra>
// kernel: tpu_custom_call.1
= control target key start
LH: loop header
LB: loop body
LE: loop exit
PB: predicated region body
PF: predicated region fallthrough
CT: control target
= control target key end

     0   :  { %7 = vsyncpa [#allocation3], 0  ;;  %s794_s0 = inlined_call_operand.vmem [shape: bf16[128,147], index: 0, kind: input, shape index: {}]   ;;  %s795_s1 = inlined_call_operand.vmem [shape: bf16[147,128], index: 1, kind: input, shape index: {}]   ;;  %s796_s2 = inlined_call_operand.hbm [shape: f32[128,128], index: 2, kind: output, shape index: {}]  }
   0x1   :  { %9 = vsyncpa [#allocation3 + $0x1], 0  ;;  %s644_s9 = smov 0   ;;  %s646_s10 = smov 0  }
   0x2   :  { %s648_s11 = smov 0   ;;  %s650_s12 = smov 0  }
   0x3 LB: > { %s665_s13 = sadd.s32 4294967295, %s622_s12   ;;  %s438_s14 = sadd.s32 4294967294, %s622_s12   ;;  %s622_s12 = sphi %s650_s12, %s802_s12   ;;  %s618_s11 = sphi %s648_s11, %s801_s11   ;;  %s614_s10 = sphi %s646_s10, %s800_s10   ;;  %s610_s9 = sphi %s644_s9, %s799_s9  }
   0x4   : > { %s669_s15 = sadd.s32 1, %s622_s12   ;;  %s69_s16 = sadd.s32 1, %s618_s11 }
   0x5   : > { %s66_s17 = ssub.s32 %s622_s12, %s669_s15  ;;  %p79_p0 = scmp.ne.s32.totalorder %s618_s11, %s614_s10 }
   0x6   : > { %p67_p1 = scmp.eq.s32.totalorder %s66_s17, 0  ;;  %p80_p2 = scmp.eq.s32.totalorder %s665_s13, 1 }
   0x7   : > { %p85_p3 = scmp.ne.s32.totalorder %s614_s10, %s610_s9  ;;  %p86_p4 = scmp.eq.s32.totalorder %s438_s14, 1 }
   0x8   : > { %s680_s18 = scalar_select %p67_p1, %s618_s11, %s69_s16  }
   0x9   : > { %p682_p5 = por %p80_p2, %p79_p0  ;;  %p686_p6 = por %p86_p4, %p85_p3 }
   0xa   : > { %p441_p7 = scmp.ge.s32.totalorder %s622_s12, 1  ;;  %p117_p8 = scmp.lt.s32.totalorder %s622_s12, 3 }
   0xc   : > { %p118_p9 = pnand %p441_p7, %p117_p8 }
   0xd   : > { %v538_v0 = vld [vmem:[%s795_s1] sm:$0xff] (!%p118_p9)   ;;  %v624_v1 = vmov (!%p118_p9), 0   ;;  %v539_v2 = vld [vmem:[%s795_s1 + $0x8] sm:$0xff] (!%p118_p9)   ;;  %v540_v3 = vld [vmem:[%s795_s1 + $0x10] sm:$0xff] (!%p118_p9)   ;;  %s443_s27 = sshll.u32 (!%p118_p9), %s665_s13, 3  ;;  %vm269_vm0 = vcmask (!%p118_p9), 154624  }
   0xe   : > { %121 = sbr.rel (%p118_p9) target bundleno = 291 (0x123), region = 28  ;;  %289 = vmatprep.subr.bf16.mxu0 (!%p118_p9), %v624_v1  ;;  %475 = vmatprep.subr.bf16.mxu1 (!%p118_p9), %v624_v1  ;;  %p141_p10 = scmp.lt.s32.totalorder (!%p118_p9), %s443_s27, 15  ;;  %v541_v4 = vld [vmem:[%s795_s1 + $0x18] sm:$0xff] (!%p118_p9)   ;;  %v542_v5 = vld [vmem:[%s795_s1 + $0x20] sm:$0xff] (!%p118_p9)   ;;  %v543_v8 = vld [vmem:[%s795_s1 + $0x28] sm:$0xff] (!%p118_p9)   ;;  %vm282_vm1 = vcmask (!%p118_p9), 1040384  }
   0xf   : > { %290 = vmatpush1.bf16.msra.mxu0 (!%p118_p9), %v538_v0  ;;  %485 = vmatpush1.bf16.msra.mxu1 (!%p118_p9), %v538_v0  ;;  %v544_v9 = vld [vmem:[%s795_s1 + $0x30] sm:$0xff] (!%p118_p9)   ;;  %v545_v10 = vld [vmem:[%s795_s1 + $0x38] sm:$0xff] (!%p118_p9)   ;;  %vm283_vm2 = vcmask (!%p118_p9), 1041408   ;;  %v625_v11 = vmov (!%p118_p9), 65535   ;;  %v546_v13 = vld [vmem:[%s795_s1 + $0x40] sm:$0xff] (!%p118_p9)   ;;  %s474_s3 = sshll.u32 (!%p118_p9), %s665_s13, 10 }
  0x10   : > { %291 = vmatprep.subr.bf16.mxu0 (!%p118_p9), %v624_v1  ;;  %476 = vmatprep.subr.bf16.mxu1 (!%p118_p9), %v624_v1  ;;  %v284_v12 = vsel (!%p118_p9), %vm282_vm1, 4294967295, %v625_v11  ;;  %v547_v14 = vld [vmem:[%s795_s1 + $0x48] ss:$0 sps:$4 sm:$0x33] (!%p118_p9)   ;;  %s749_s6 = scalar_lea.hbm (!%p118_p9), %s796_s2, %s474_s3  ;;  %s626_s8 = smov (!%p118_p9), [#allocation2]  }
  0x11   : > { %v285_v15 = vsel (!%p118_p9), %vm283_vm2, %v284_v12, 0  ;;  %s564_s14 = sshll.u32 (!%p118_p9), %s626_s8, 4  ;;  %s565_s14 = int_to_ptr.vmem [resolvable:$false] %s564_s14 }
  0x12   : > { %v287_v16 = vand.u32 (!%p118_p9), %v547_v14, %v285_v15  ;;  %s566_s16 = scalar_lea.vmem (!%p118_p9), %s565_s14, 2048 }
  0x13   : > { %292 = vmatpush1.bf16.msra.mxu0 (!%p118_p9), %v539_v2  ;;  %486 = vmatpush1.bf16.msra.mxu1 (!%p118_p9), %v539_v2 }
  0x14   : > { %293 = vmatprep.subr.bf16.mxu0 (!%p118_p9), %v624_v1  ;;  %477 = vmatprep.subr.bf16.mxu1 (!%p118_p9), %v624_v1 }
  0x15   : > { %s804_s27 = smov (!%p141_p10, %s443_s27), 15 }
  0x16   : > { %s473_s30 = sshll.u32 %s804_s27, 3  ;;  %s137_s27 = sand.u32 1, %s614_s10  }
  0x17   : > { %294 = vmatpush1.bf16.msra.mxu0 %v540_v3  ;;  %487 = vmatpush1.bf16.msra.mxu1 %v540_v3  ;;  %s708_s5 = scalar_lea.vmem %s794_s0, %s473_s30  ;;  %s442_s28 = sshll.u32 %s137_s27, 6 }
  0x18   : > { %295 = vmatprep.subr.bf16.mxu0 %v624_v1  ;;  %478 = vmatprep.subr.bf16.mxu1 %v624_v1  ;;  %v550_v6 = vld [vmem:[%s708_s5 + $0x4] ss:$8 sps:$4 sm:$0xff]   ;;  %v548_v17 = vld [vmem:[%s708_s5] ss:$8 sps:$4 sm:$0xff]   ;;  %v554_v19 = vld [vmem:[%s708_s5 + $0x14] ss:$8 sps:$4 sm:$0xff]  }
  0x19   : > { %v553_v7 = vld [vmem:[%s708_s5 + $0x24] ss:$8 sps:$4 sm:$0xff]   ;;  %464 = vmatprep.mubr.msk.bf16.mxu0 %vm269_vm0, %v550_v6  ;;  %v551_v18 = vld [vmem:[%s708_s5 + $0x20] ss:$8 sps:$4 sm:$0xff]   ;;  %v556_v20 = vld [vmem:[%s708_s5 + $0x34] ss:$8 sps:$4 sm:$0xff]  }
  0x1a   : > { %466 = vmatprep.mubr.msk.bf16.mxu1 %vm269_vm0, %v553_v7  ;;  %v558_v21 = vld [vmem:[%s708_s5 + $0x10] ss:$8 sps:$4 sm:$0xff]   ;;  %s139_s29 = scalar_lea.vmem [#allocation2], %s442_s28  ;;  %s753_s13 = scalar_lea.sflag [#allocation3], %s137_s27 }
  0x1b   : > { %296 = vmatpush1.bf16.msra.mxu0 %v541_v4  ;;  %488 = vmatpush1.bf16.msra.mxu1 %v541_v4  ;;  %v559_v22 = vld [vmem:[%s708_s5 + $0x30] ss:$8 sps:$4 sm:$0xff]   ;;  %s376_s30 = sshll.u32 %s139_s29, 4  ;;  %s744_s30 = int_to_ptr.vmem [resolvable:$true] %s376_s30 }
  0x1c   : > { %297 = vmatprep.subr.bf16.mxu0 %v624_v1  ;;  %479 = vmatprep.subr.bf16.mxu1 %v624_v1  ;;  %s560_s7 = scalar_lea.vmem %s744_s30, 1024  ;;  %p567_p0 = scmp.lt.s32.totalorder %s744_s30, %s565_s14 }
  0x1d   : > { %p561_p11 = scmp.ne.s32.totalorder %s744_s30, %s560_s7  ;;  %p568_p1 = scmp.lt.s32.totalorder %s566_s16, %s560_s7 }
  0x1f   : > { %298 = vmatpush1.bf16.msra.mxu0 %v542_v5  ;;  %489 = vmatpush1.bf16.msra.mxu1 %v542_v5  ;;  %p562_p12 = pnand %p561_p11, %p682_p5  ;;  %p569_p2 = por %p568_p1, %p567_p0 }
  0x20   : > { %299 = vmatprep.subr.bf16.mxu0 %v624_v1  ;;  %480 = vmatprep.subr.bf16.mxu1 %v624_v1 }
  0x21   : > { %p563_p13 = pneg %p562_p12 }
  0x23   : > { %300 = vmatpush1.bf16.msra.mxu0 %v543_v8  ;;  %490 = vmatpush1.bf16.msra.mxu1 %v543_v8  ;;  %p570_p3 = pnand %p569_p2, %p563_p13 }
  0x24   : > { %301 = vmatprep.subr.bf16.mxu0 %v624_v1  ;;  %481 = vmatprep.subr.bf16.mxu1 %v624_v1 }
  0x27   : > { %302 = vmatpush1.bf16.msra.mxu0 %v544_v9  ;;  %491 = vmatpush1.bf16.msra.mxu1 %v544_v9 }
  0x28   : > { %303 = vmatprep.subr.bf16.mxu0 %v624_v1  ;;  %482 = vmatprep.subr.bf16.mxu1 %v624_v1 }
  0x2b   : > { %304 = vmatpush1.bf16.msra.mxu0 %v545_v10  ;;  %492 = vmatpush1.bf16.msra.mxu1 %v545_v10 }
  0x2c   : > { %305 = vmatprep.subr.bf16.mxu0 %v624_v1  ;;  %483 = vmatprep.subr.bf16.mxu1 %v624_v1 }
  0x2f   : > { %306 = vmatpush1.bf16.msra.mxu0 %v546_v13  ;;  %493 = vmatpush1.bf16.msra.mxu1 %v546_v13 }
  0x30   : > { %307 = vmatprep.subr.bf16.mxu0 %v624_v1  ;;  %484 = vmatprep.subr.bf16.mxu1 %v624_v1 }
  0x33   : > { %308 = vmatpush1.bf16.msra.mxu0 %v287_v16  ;;  %494 = vmatpush1.bf16.msra.mxu1 %v287_v16 }
  0x36   : > { %322 = vmatmul.mubr.bf16.vlgmr.msra.gmra.mrb[0].mxu0 %v548_v17  ;;  %338 = vmatmul.mubr.bf16.vlgmr.msra.gmra.mrb[0].mxu1 %v551_v18 }
  0x37   : > { %465 = vmatprep.mubr.msk.bf16.mxu0 %vm269_vm0, %v554_v19  ;;  %467 = vmatprep.mubr.msk.bf16.mxu1 %vm269_vm0, %v556_v20 }
  0x3e   : > { %330 = vmatmul.mubr.bf16.gmra.mrb[4].mxu0 %v558_v21  ;;  %346 = vmatmul.mubr.bf16.gmra.mrb[4].mxu1 %v559_v22 }
 0x109   : > { %v323_v23 = vpop.f32.mrb[0].mxu0  ;;  %v339_v24 = vpop.f32.mrb[0].mxu1 }
 0x10a   : > { %354 = vst [vmem:[%s139_s29] sm:$0xff] %v323_v23  ;;  %358 = vst [vmem:[%s139_s29 + $0x20] sm:$0xff] %v339_v24  ;;  %v325_v25 = vpop.f32.mrb[1].mxu0  ;;  %v341_v26 = vpop.f32.mrb[1].mxu1 }
 0x10b   : > { %v326_v27 = vpop.f32.mrb[2].mxu0  ;;  %v342_v28 = vpop.f32.mrb[2].mxu1 }
 0x10c   : > { %355 = vst [vmem:[%s139_s29 + $0x8] sm:$0xff] %v326_v27  ;;  %359 = vst [vmem:[%s139_s29 + $0x28] sm:$0xff] %v342_v28  ;;  %v328_v29 = vpop.f32.mrb[3].mxu0  ;;  %v344_v30 = vpop.f32.mrb[3].mxu1 }
 0x111   : > { %v331_v31 = vpop.f32.mrb[4].mxu0  ;;  %v347_v32 = vpop.f32.mrb[4].mxu1 }
 0x112   : > { %356 = vst [vmem:[%s139_s29 + $0x10] sm:$0xff] %v331_v31  ;;  %360 = vst [vmem:[%s139_s29 + $0x30] sm:$0xff] %v347_v32  ;;  %v333_v33 = vpop.f32.mrb[5].mxu0  ;;  %v349_v34 = vpop.f32.mrb[5].mxu1 }
 0x113   : > { %v334_v35 = vpop.f32.mrb[6].mxu0  ;;  %v350_v36 = vpop.f32.mrb[6].mxu1 }
 0x114   : > { %357 = vst [vmem:[%s139_s29 + $0x18] sm:$0xff] %v334_v35  ;;  %361 = vst [vmem:[%s139_s29 + $0x38] sm:$0xff] %v350_v36  ;;  %v336_v37 = vpop.f32.mrb[7].mxu0  ;;  %v352_v38 = vpop.f32.mrb[7].mxu1 }
 0x115   : > { %573 = shalt.err (!%p570_p3)
}
 0x116   : > { %s574_s17 = scalar_lea.hbm %s749_s6, 1024  ;;  %s578_s23 = scalar_lea.hbm %s796_s2, 2048 }
 0x117   : > { %p575_p4 = scmp.ne.s32.totalorder %s749_s6, %s574_s17  ;;  %p579_p9 = scmp.lt.u32.totalorder %s749_s6, %s796_s2 }
 0x118   : > { %p580_p10 = scmp.lt.u32.totalorder %s578_s23, %s574_s17  ;;  %p582_p12 = scmp.lt.u32.totalorder %s574_s17, %s749_s6 }
 0x119   : > { %p576_p7 = pnand %p575_p4, %p682_p5 }
 0x11a   : > { %p581_p11 = por %p580_p10, %p579_p9 }
 0x11b   : > { %p577_p8 = pneg %p576_p7 }
 0x11c   : > { %p583_p13 = por %p582_p12, %p581_p11 }
 0x11e   : > { %p584_p0 = pnand %p583_p13, %p577_p8 }
 0x120   : > { %587 = shalt.err (!%p584_p0)
}
 0x121   : > { %s627_s26 = smov 128   ;;  %s628_s27 = smov 8  }
 0x122   : > { %495 = dma.vmem_to_hbm [thread:$0]  (%p682_p5), %s744_s30, 1024, %s749_s6, %s753_s13, %s627_s26, %s627_s26, %s628_s27  }
 0x123 PF: > { %p501_p1 = scmp.ge.s32.totalorder %s622_s12, 2  ;;  %s391_s28 = sand.u32 1, %s610_s9  }
 0x124   : > { %s392_s29 = scalar_lea.sflag [#allocation3], %s391_s28 }
 0x125   : > { %p498_p2 = pnand %p501_p1, %p686_p6 }
 0x127   : > { %605 = dma.done.wait (!%p498_p2), %s392_s29, 1024  }
 0x128   : > { %607 = vsyncadd (!%p498_p2), %s392_s29, 4294966272  ;;  %p12_p3 = scmp.ge.s32.totalorder %s669_s15, 4   ;;  %s799_s9 = smov %s614_s10 }
 0x129   : > { %s800_s10 = smov %s618_s11  ;;  %s801_s11 = smov %s680_s18 }
 0x12a   : > { %s802_s12 = smov %s669_s15  ;;  %14 = sbr.rel (!%p12_p3) target bundleno = 3 (0x3), region = 63 }
 0x131   :  { %397 = vsyncpa [#allocation3], 1 }
 0x132   :  { %399 = vsyncpa [#allocation3 + $0x1], 1 }

</bundles_post_ra>
